<compile_context>
chip_gen: v7x
topology: tpu7x:2x2x1
jax: 0.10.0
libtpu: 0.0.40
codegen_flags: <defaults>
</compile_context>

<pallas_src>
import math
import functools

import jax
import jax.numpy as jnp
from jax.experimental import pallas as pl
from jax.experimental.pallas import tpu as pltpu


# ---------------------------------------------------------------------------
# Linear projection kernel: y = x @ W + b   (W already transposed to (in, out))
# ---------------------------------------------------------------------------
def _linear_kernel(x_ref, w_ref, b_ref, o_ref):
    x = x_ref[...].astype(jnp.float32)
    w = w_ref[...].astype(jnp.float32)
    b = b_ref[...].astype(jnp.float32)
    y = jnp.dot(x, w, preferred_element_type=jnp.float32) + b
    o_ref[...] = y.astype(o_ref.dtype)


def linear(x2d, w_t, b, *, tile_rows=512):
    """x2d: (rows, h_in), w_t: (h_in, h_out), b: (h_out,) -> (rows, h_out)."""
    rows, h_in = x2d.shape
    h_out = w_t.shape[1]
    tr = min(tile_rows, rows)
    grid = (pl.cdiv(rows, tr),)

    cost = pl.CostEstimate(
        flops=2 * rows * h_in * h_out,
        transcendentals=0,
        bytes_accessed=4 * (rows * h_in + h_in * h_out + h_out + rows * h_out),
    )

    return pl.pallas_call(
        _linear_kernel,
        out_shape=jax.ShapeDtypeStruct((rows, h_out), x2d.dtype),
        grid_spec=pltpu.PrefetchScalarGridSpec(
            num_scalar_prefetch=0,
            grid=grid,
            in_specs=[
                pl.BlockSpec((tr, h_in), lambda i: (i, 0)),
                pl.BlockSpec((h_in, h_out), lambda i: (0, 0)),  # resident weight
                pl.BlockSpec((1, h_out), lambda i: (0, 0)),     # resident bias
            ],
            out_specs=pl.BlockSpec((tr, h_out), lambda i: (i, 0)),
        ),
        compiler_params=pltpu.CompilerParams(
            dimension_semantics=("parallel",),
        ),
        cost_estimate=cost,
    )(x2d, w_t, b.reshape(1, h_out))


# ---------------------------------------------------------------------------
# Flash-attention kernel (online softmax over KV tiles), grid = (B*H, Sq, Sk)
# ---------------------------------------------------------------------------
def _mha_flash_kernel(q_ref, k_ref, v_ref, mask_ref, o_ref,
                      m_sc, l_sc, acc_sc, *, sm_scale, seq_len, block_k):
    ki = pl.program_id(2)

    @pl.when(ki == 0)
    def _():
        m_sc[...] = jnp.full(m_sc.shape, -jnp.inf, jnp.float32)
        l_sc[...] = jnp.zeros(l_sc.shape, jnp.float32)
        acc_sc[...] = jnp.zeros(acc_sc.shape, jnp.float32)

    # softmax scale folded into Q (tq*d multiplies instead of tq*tk)
    q = q_ref[0].astype(jnp.float32) * sm_scale   # (tq, d)
    k = k_ref[0].astype(jnp.float32)              # (tk, d)
    v = v_ref[0].astype(jnp.float32)              # (tk, d)
    msk = mask_ref[0]                             # (1 | tq, tk); 1 = keep, 0 = mask

    # scores = (q * scale) @ k^T
    s = jax.lax.dot_general(
        q, k, (((1,), (1,)), ((), ())),
        preferred_element_type=jnp.float32)

    # user mask: masked_fill(mask == 0, -1e9), exactly like the PyTorch module
    s = jnp.where(msk != 0, s, -1e9)
    # KV bounds mask for a partial last tile (-inf -> zero probability)
    kv_pos = ki * block_k + jax.lax.broadcasted_iota(jnp.int32, s.shape, 1)
    s = jnp.where(kv_pos < seq_len, s, -jnp.inf)

    m_prev = m_sc[...]                                   # (tq, 1)
    m_new = jnp.maximum(m_prev, jnp.max(s, axis=-1, keepdims=True))
    alpha = jnp.exp(m_prev - m_new)
    p = jnp.exp(s - m_new)                               # (tq, tk)

    l_sc[...] = alpha * l_sc[...] + jnp.sum(p, axis=-1, keepdims=True)
    acc_sc[...] = alpha * acc_sc[...] + jnp.dot(
        p, v, preferred_element_type=jnp.float32)
    m_sc[...] = m_new

    @pl.when(ki == pl.num_programs(2) - 1)
    def _():
        inv_l = pl.reciprocal(l_sc[...], approx=True)    # EUP, off the VALU path
        o_ref[0] = (acc_sc[...] * inv_l).astype(o_ref.dtype)


def flash_mha(q, k, v, mask3, num_heads, *, mask_per_query,
              block_q=256, block_k=256):
    """q, k, v: (B*H, S, d); mask3: (B, 1, S) or (B, S, S). Returns (B*H, S, d)."""
    bh, seq, d = q.shape
    tq = min(block_q, seq)
    tk = min(block_k, seq)
    sm_scale = 1.0 / math.sqrt(d)
    grid = (bh, pl.cdiv(seq, tq), pl.cdiv(seq, tk))

    if mask_per_query:
        mq = tq
        mask_map = lambda b, qi, ki: (b // num_heads, qi, ki)
    else:
        mq = 1
        mask_map = lambda b, qi, ki: (b // num_heads, 0, ki)

    kernel = functools.partial(
        _mha_flash_kernel, sm_scale=sm_scale, seq_len=seq, block_k=tk)

    cost = pl.CostEstimate(
        flops=4 * bh * seq * seq * d,
        transcendentals=bh * seq * seq,
        bytes_accessed=4 * (4 * bh * seq * d + mask3.size),
    )

    return pl.pallas_call(
        kernel,
        out_shape=jax.ShapeDtypeStruct((bh, seq, d), q.dtype),
        grid_spec=pltpu.PrefetchScalarGridSpec(
            num_scalar_prefetch=0,
            grid=grid,
            in_specs=[
                pl.BlockSpec((1, tq, d), lambda b, qi, ki: (b, qi, 0)),
                pl.BlockSpec((1, tk, d), lambda b, qi, ki: (b, ki, 0)),
                pl.BlockSpec((1, tk, d), lambda b, qi, ki: (b, ki, 0)),
                pl.BlockSpec((1, mq, tk), mask_map),
            ],
            out_specs=pl.BlockSpec((1, tq, d), lambda b, qi, ki: (b, qi, 0)),
            scratch_shapes=[
                pltpu.VMEM((tq, 1), jnp.float32),   # running max m
                pltpu.VMEM((tq, 1), jnp.float32),   # running sum l
                pltpu.VMEM((tq, d), jnp.float32),   # output accumulator
            ],
        ),
        compiler_params=pltpu.CompilerParams(
            dimension_semantics=("parallel", "parallel", "arbitrary"),
        ),
        cost_estimate=cost,
    )(q, k, v, mask3)


# ---------------------------------------------------------------------------
# Mask normalization: return ((B,1,S) key-only mask, False) when the mask is
# query-independent (the common BERT padding mask), else ((B,S,S), True).
# ---------------------------------------------------------------------------
def _normalize_mask(mask, batch, seq):
    if mask is None:
        return jnp.ones((batch, 1, seq), jnp.float32), False
    m = mask.astype(jnp.float32)
    if m.ndim == 4:            # (B, 1|h, 1|S, S): assume head-independent
        m = m[:, 0]
    if m.ndim == 2:            # (B, S) key-padding mask
        m = m[:, None, :]
    if m.shape[1] == 1:        # query-independent -> stream only (B, 1, S)
        return jnp.broadcast_to(m, (batch, 1, seq)), False
    return jnp.broadcast_to(m, (batch, seq, seq)), True


# ---------------------------------------------------------------------------
# MultiHeadedAttention forward wrapper
# ---------------------------------------------------------------------------
def multi_headed_attention(q_in, k_in, v_in,
                           wq, bq, wk, bk, wv, bv, wo, bo,
                           mask=None, *, num_heads):
    batch, seq, hidden = q_in.shape
    assert hidden % num_heads == 0
    d_k = hidden // num_heads

    def split_heads(y2d):
        # 'b t (h d) -> b h t d', fold (b, h) for the attention grid
        return (y2d.reshape(batch, seq, num_heads, d_k)
                   .transpose(0, 2, 1, 3)
                   .reshape(batch * num_heads, seq, d_k))

    if (q_in is k_in) and (k_in is v_in):
        # Self-attention: fuse the three projections -> read activations once.
        w_qkv = jnp.concatenate([wq.T, wk.T, wv.T], axis=1)   # (hidden, 3*hidden)
        b_qkv = jnp.concatenate([bq, bk, bv])
        qkv = linear(q_in.reshape(batch * seq, hidden), w_qkv, b_qkv)
        q2d, k2d, v2d = jnp.split(qkv, 3, axis=1)
        q, k, v = split_heads(q2d), split_heads(k2d), split_heads(v2d)
    else:
        q = split_heads(linear(q_in.reshape(batch * seq, hidden), wq.T, bq))
        k = split_heads(linear(k_in.reshape(batch * seq, hidden), wk.T, bk))
        v = split_heads(linear(v_in.reshape(batch * seq, hidden), wv.T, bv))

    mask3, per_query = _normalize_mask(mask, batch, seq)

    ctx = flash_mha(q, k, v, mask3, num_heads, mask_per_query=per_query)
    # 'b h t d -> b t (h d)'
    ctx = (ctx.reshape(batch, num_heads, seq, d_k)
              .transpose(0, 2, 1, 3)
              .reshape(batch * seq, hidden))
    out = linear(ctx, wo.T, bo)
    return out.reshape(batch, seq, hidden)


# ---------------------------------------------------------------------------
# Demo + reference check
# ---------------------------------------------------------------------------
if __name__ == "__main__":
    key = jax.random.PRNGKey(0)
    batch, seq, hidden, num_heads = 2, 8, 32, 4
    d_k = hidden // num_heads
    keys = jax.random.split(key, 12)

    x_q = jax.random.normal(keys[0], (batch, seq, hidden), jnp.float32)
    x_k = jax.random.normal(keys[1], (batch, seq, hidden), jnp.float32)
    x_v = jax.random.normal(keys[2], (batch, seq, hidden), jnp.float32)

    def init_linear(kw, kb):
        lim = 1.0 / math.sqrt(hidden)
        w = jax.random.uniform(kw, (hidden, hidden), jnp.float32, -lim, lim)
        b = jax.random.uniform(kb, (hidden,), jnp.float32, -lim, lim)
        return w, b

    wq, bq = init_linear(keys[3], keys[4])
    wk, bk = init_linear(keys[5], keys[6])
    wv, bv = init_linear(keys[7], keys[8])
    wo, bo = init_linear(keys[9], keys[10])

    # BERT-style padding mask: batch 0 fully valid, batch 1 has 5 valid tokens
    lengths = jnp.array([seq, 5], dtype=jnp.int32)
    mask = (jnp.arange(seq)[None, :] < lengths[:, None]).astype(jnp.float32)
    mask = mask[:, None, None, :]                         # (B, 1, 1, S)

    # ----- pure-JAX reference (high precision) -----
    hp = jax.lax.Precision.HIGHEST

    def lin_ref(x, w, b):
        return jnp.einsum('bsh,oh->bso', x, w, precision=hp) + b

    def split_heads_ref(x):
        return x.reshape(batch, seq, num_heads, d_k).transpose(0, 2, 1, 3)

    def mha_ref(xq, xk, xv, msk):
        q_r = split_heads_ref(lin_ref(xq, wq, bq))
        k_r = split_heads_ref(lin_ref(xk, wk, bk))
        v_r = split_heads_ref(lin_ref(xv, wv, bv))
        scores = jnp.einsum('bhqd,bhkd->bhqk', q_r, k_r,
                            precision=hp) / math.sqrt(d_k)
        if msk is not None:
            scores = jnp.where(msk == 0, -1e9, scores)
        p_attn = jax.nn.softmax(scores, axis=-1)
        ctx_r = jnp.einsum('bhqk,bhkd->bhqd', p_attn, v_r, precision=hp)
        ctx_r = ctx_r.transpose(0, 2, 1, 3).reshape(batch, seq, hidden)
        return lin_ref(ctx_r, wo, bo)

    # --- check 1: cross-attention (separate q/k/v), padding mask path ---
    out = multi_headed_attention(x_q, x_k, x_v,
                                 wq, bq, wk, bk, wv, bv, wo, bo,
                                 mask=mask, num_heads=num_heads)
    out = jax.block_until_ready(out)
    ref = mha_ref(x_q, x_k, x_v, mask)
    assert out.shape == ref.shape
    assert jnp.allclose(out, ref, atol=2e-2, rtol=2e-2), (
        "cross-attn mismatch vs reference: max abs err = %e"
        % float(jnp.max(jnp.abs(out - ref))))

    # --- check 2: self-attention (fused QKV projection), no mask ---
    out2 = multi_headed_attention(x_q, x_q, x_q,
                                  wq, bq, wk, bk, wv, bv, wo, bo,
                                  mask=None, num_heads=num_heads)
    out2 = jax.block_until_ready(out2)
    ref2 = mha_ref(x_q, x_q, x_q, None)
    assert jnp.allclose(out2, ref2, atol=2e-2, rtol=2e-2), (
        "self-attn mismatch vs reference: max abs err = %e"
        % float(jnp.max(jnp.abs(out2 - ref2))))

    print("KERNEL_OK")
</pallas_src>

<mosaic_0001>
module attributes {stable_mosaic.version = 11 : i64} {
  func.func @_linear_kernel(%arg0: i32, %arg1: memref<16x32xf32, #tpu.memory_space<vmem>>, %arg2: memref<32x32xf32, #tpu.memory_space<vmem>>, %arg3: memref<1x32xf32, #tpu.memory_space<vmem>>, %arg4: memref<16x32xf32, #tpu.memory_space<vmem>>) attributes {dimension_semantics = [#tpu.dimension_semantics<parallel>], iteration_bounds = array<i64: 1>, scalar_prefetch = 0 : i64, scratch_operands = 0 : i64, tpu.core_type = #tpu.core_type<tc>, window_params = [{transform_indices = @transform_0, window_bounds = array<i64: 16, 32>}, {pipeline_mode = #tpu.pipeline_mode<synchronous>, transform_indices = @transform_1, window_bounds = array<i64: 32, 32>}, {pipeline_mode = #tpu.pipeline_mode<synchronous>, transform_indices = @transform_2, window_bounds = array<i64: 1, 32>}, {transform_indices = @transform_3, window_bounds = array<i64: 16, 32>}]} {
    %c0 = arith.constant 0 : index
    %c0_0 = arith.constant 0 : index
    %0 = vector.load %arg1[%c0, %c0_0] : memref<16x32xf32, #tpu.memory_space<vmem>>, vector<16x32xf32>
    %c0_1 = arith.constant 0 : index
    %c0_2 = arith.constant 0 : index
    %1 = vector.load %arg2[%c0_1, %c0_2] : memref<32x32xf32, #tpu.memory_space<vmem>>, vector<32x32xf32>
    %c0_3 = arith.constant 0 : index
    %c0_4 = arith.constant 0 : index
    %2 = vector.load %arg3[%c0_3, %c0_4] : memref<1x32xf32, #tpu.memory_space<vmem>>, vector<1x32xf32>
    %cst = arith.constant dense<0.000000e+00> : vector<16x32xf32>
    %3 = tpu.matmul %0, %1, %cst {dimension_numbers = #tpu.dot_dimension_numbers<[1], [0], [0], [1], [0, 0, 1, 1], [], []>} : vector<16x32xf32>, vector<32x32xf32>, vector<16x32xf32> -> vector<16x32xf32>
    %4 = vector.broadcast %2 : vector<1x32xf32> to vector<16x32xf32>
    %5 = arith.addf %3, %4 : vector<16x32xf32>
    %c0_5 = arith.constant 0 : index
    %c0_6 = arith.constant 0 : index
    %6 = vector.load %arg4[%c0_5, %c0_6] : memref<16x32xf32, #tpu.memory_space<vmem>>, vector<16x32xf32>
    tpu.vector_store %arg4[%c0_5, %c0_6], %5 {strides = array<i32>} : memref<16x32xf32, #tpu.memory_space<vmem>>, vector<16x32xf32>,
    return
  }
  func.func @transform_0(%arg0: i32) -> (i32, i32) {
    %c0_i32 = arith.constant 0 : i32
    %c0_i32_0 = arith.constant 0 : i32
    return %arg0, %c0_i32 : i32, i32
  }
  func.func @transform_1(%arg0: i32) -> (i32, i32) {
    %c0_i32 = arith.constant 0 : i32
    %c0_i32_0 = arith.constant 0 : i32
    %c0_i32_1 = arith.constant 0 : i32
    return %c0_i32, %c0_i32_0 : i32, i32
  }
  func.func @transform_2(%arg0: i32) -> (i32, i32) {
    %c0_i32 = arith.constant 0 : i32
    %c0_i32_0 = arith.constant 0 : i32
    %c0_i32_1 = arith.constant 0 : i32
    return %c0_i32, %c0_i32_0 : i32, i32
  }
  func.func @transform_3(%arg0: i32) -> (i32, i32) {
    %c0_i32 = arith.constant 0 : i32
    %c0_i32_0 = arith.constant 0 : i32
    return %arg0, %c0_i32 : i32, i32
  }
}

</mosaic_0001>

<bundles_post_ra>
// kernel: tpu_custom_call.1
= control target key start
LH: loop header
LB: loop body
LE: loop exit
PB: predicated region body
PF: predicated region fallthrough
CT: control target
= control target key end

     0   :  { %8 = vsyncpa [#allocation3], 0  ;;  %s340_s0 = inlined_call_operand.hbm [shape: f32[16,32], index: 0, kind: input, shape index: {}]   ;;  %s341_s1 = inlined_call_operand.hbm [shape: f32[32,32], index: 1, kind: input, shape index: {}]   ;;  %s342_s2 = inlined_call_operand.vmem [shape: f32[1,32], index: 2, kind: input, shape index: {}]   ;;  %s343_s3 = inlined_call_operand.hbm [shape: f32[16,32], index: 3, kind: output, shape index: {}]  }
   0x1   :  { %9 = vsyncpa [#allocation6], 0 }
   0x2   :  { %10 = vsyncpa [#allocation4], 0  ;;  %s263_s12 = smov [#allocation2]   ;;  %s191_s16 = scalar_lea.hbm %s340_s0, 256 }
   0x3   :  { %s16_s13 = sshll.u32 %s263_s12, 4  ;;  %p192_p0 = scmp.ne.s32.totalorder %s340_s0, %s191_s16  ;;  %s17_s13 = int_to_ptr.vmem [resolvable:$true] %s16_s13 }
   0x4   :  { %p195_p1 = scmp.lt.u32.totalorder %s191_s16, %s340_s0 }
   0x6   :  { %p197_p2 = pnand %p195_p1, %p192_p0 }
   0x8   :  { %200 = shalt.err (!%p197_p2)
}
   0x9   :  { %s201_s21 = scalar_lea.vmem %s17_s13, 256  ;;  %p206_p4 = scmp.lt.s32.totalorder %s17_s13, %s17_s13 }
   0xa   :  { %p202_p3 = scmp.ne.s32.totalorder %s17_s13, %s201_s21  ;;  %p207_p5 = scmp.lt.s32.totalorder %s201_s21, %s201_s21 }
   0xc   :  { %p208_p6 = por %p207_p5, %p206_p4 }
   0xe   :  { %p209_p7 = pnand %p208_p6, %p202_p3 }
  0x10   :  { %212 = shalt.err (!%p209_p7)
}
  0x11   :  { %s264_s22 = smov 128   ;;  %s265_s23 = smov 8  }
  0x12   :  { %22 = dma.hbm_to_vmem [thread:$0]  %s340_s0, 256, %s17_s13, [#allocation3], %s264_s22, %s264_s22, %s265_s23  }
  0x13   :  { %s266_s26 = smov [#allocation5]   ;;  %s213_s30 = scalar_lea.hbm %s341_s1, 512 }
  0x14   :  { %s28_s27 = sshll.u32 %s266_s26, 4  ;;  %p214_p8 = scmp.ne.s32.totalorder %s341_s1, %s213_s30  ;;  %s29_s27 = int_to_ptr.vmem [resolvable:$true] %s28_s27 }
  0x15   :  { %p217_p9 = scmp.lt.u32.totalorder %s213_s30, %s341_s1 }
  0x17   :  { %p219_p10 = pnand %p217_p9, %p214_p8 }
  0x19   :  { %222 = shalt.err (!%p219_p10)
}
  0x1a   :  { %s223_s8 = scalar_lea.vmem %s29_s27, 512  ;;  %p228_p12 = scmp.lt.s32.totalorder %s29_s27, %s29_s27 }
  0x1b   :  { %p224_p11 = scmp.ne.s32.totalorder %s29_s27, %s223_s8  ;;  %p229_p13 = scmp.lt.s32.totalorder %s223_s8, %s223_s8 }
  0x1d   :  { %p230_p0 = por %p229_p13, %p228_p12 }
  0x1f   :  { %p231_p1 = pnand %p230_p0, %p224_p11 }
  0x21   :  { %234 = shalt.err (!%p231_p1)
}
  0x22   :  { %34 = dma.hbm_to_vmem [thread:$0]  %s341_s1, 512, %s29_s27, [#allocation6], %s264_s22, %s264_s22, %s265_s23  }
  0x23   :  { %257 = dma.done.wait [#allocation3], 256  }
  0x24   :  { %258 = vsyncadd [#allocation3], 4294967040 }
  0x25   :  { %259 = dma.done.wait [#allocation6], 512  }
  0x26   :  { %260 = vsyncadd [#allocation6], 4294966784  ;;  %vm56_vm0 = vcmask 261120   ;;  %v45_v0 = vld [vmem:[#allocation5] sm:$0xff]  ;;  %v46_v1 = vld [vmem:[#allocation5 + $0x8] sm:$0xff]  ;;  %s267_s11 = smov [#allocation7]  }
  0x27   :  { %v47_v2 = vld [vmem:[#allocation5 + $0x10] sm:$0xff]  ;;  %v178_v3 = vpack.c.bf16 %v46_v1, %v45_v0  ;;  %v48_v4 = vld [vmem:[#allocation5 + $0x18] sm:$0xff]  ;;  %s145_s12 = sshll.u32 %s267_s11, 4  ;;  %s146_s12 = int_to_ptr.vmem [resolvable:$true] %s145_s12 }
  0x28   :  { %v43_v5 = vld [vmem:[#allocation2] sm:$0xff]  ;;  %v182_v6 = vpack.c.bf16 %v48_v4, %v47_v2  ;;  %v44_v7 = vld [vmem:[#allocation2 + $0x8] sm:$0xff]  ;;  %s235_s13 = scalar_lea.vmem %s146_s12, 256  ;;  %p240_p3 = scmp.lt.s32.totalorder %s146_s12, %s146_s12 }
  0x29   :  { %175 = vmatprep.mubr.msk.f32.mxu0 %vm56_vm0, %v43_v5  ;;  %179 = vmatprep.subr.bf16.mxu0 %v178_v3  ;;  %v158_v8 = vld [vmem:[%s342_s2] ss:$0 sm:$0xff]  ;;  %p236_p2 = scmp.ne.s32.totalorder %s146_s12, %s235_s13  ;;  %p241_p4 = scmp.lt.s32.totalorder %s235_s13, %s235_s13 }
  0x2a   :  { %181 = vmatpush3.bf16.msra.mxu0 %v178_v3 }
  0x2b   :  { %183 = vmatprep.subr.bf16.mxu0 %v182_v6  ;;  %p242_p5 = por %p241_p4, %p240_p3 }
  0x2d   :  { %p243_p6 = pnand %p242_p5, %p236_p2 }
  0x2e   :  { %185 = vmatpush3.bf16.msra.mxu0 %v182_v6 }
  0x31   :  { %176 = vmatmul.mubr.msk.f32.vlgmr.msra.gmra.mrb[0].mxu0 %vm56_vm0, %v44_v7 }
 0x104   :  { %v177_v9 = vpop.f32.mrb[0].mxu0 }
 0x105   :  { %v135_v10 = vadd.f32 %v177_v9, %v158_v8  ;;  %v129_v11 = vpop.f32.mrb[1].mxu0 }
 0x106   :  { %v130_v12 = vadd.f32 %v158_v8, %v129_v11 }
 0x107   :  { %139 = vst.msk [vmem:[#allocation7 + $0x8] sm:$0xff] %vm56_vm0, %v135_v10 }
 0x108   :  { %138 = vst.msk [vmem:[#allocation7] sm:$0xff] %vm56_vm0, %v130_v12 }
 0x109   :  { %246 = shalt.err (!%p243_p6)
}
 0x10a   :  { %s247_s15 = scalar_lea.hbm %s343_s3, 256 }
 0x10b   :  { %p248_p7 = scmp.ne.s32.totalorder %s343_s3, %s247_s15  ;;  %p251_p8 = scmp.lt.u32.totalorder %s247_s15, %s343_s3 }
 0x10d   :  { %p253_p9 = pnand %p251_p8, %p248_p7 }
 0x10f   :  { %256 = shalt.err (!%p253_p9)
}
 0x110   :  { %151 = dma.vmem_to_hbm [thread:$0]  %s146_s12, 256, %s343_s3, [#allocation4], %s264_s22, %s264_s22, %s265_s23  }
 0x111   :  { %261 = dma.done.wait [#allocation4], 256  }
 0x112   :  { %262 = vsyncadd [#allocation4], 4294967040 }
 0x113   :  { %155 = vsyncpa [#allocation3], 1 }
 0x114   :  { %156 = vsyncpa [#allocation6], 1 }
 0x115   :  { %157 = vsyncpa [#allocation4], 1 }

</bundles_post_ra>
